<compile_context>
chip_gen: v7x
topology: tpu7x:2x2x1
jax: 0.10.0
libtpu: 0.0.40
codegen_flags: <defaults>
</compile_context>

<pallas_src>
import functools

import jax
import jax.numpy as jnp
from jax.experimental import pallas as pl
from jax.experimental.pallas import tpu as pltpu


# Buffer budget used for tile sizing and the explicit scoped-VMEM limit.
# 28 MiB of buffers + headroom stays inside v7x's 64 MiB physical VMEM and is
# well above v5e's 16 MiB default scoped limit.
_VMEM_BUDGET = 28 * 1024 * 1024
_VMEM_LIMIT = 48 * 1024 * 1024


def _round_up(n, m):
    return ((n + m - 1) // m) * m


def _linear_kernel(x_ref, wt_ref, b_ref, o_ref, acc_ref):
    """acc += (tm, tk) @ (tk, out_pad) on the MXU (f32 acc); bias fused at the end."""
    k = pl.program_id(1)

    @pl.when(k == 0)
    def _():
        acc_ref[...] = jnp.zeros_like(acc_ref)

    acc_ref[...] += jnp.dot(x_ref[...], wt_ref[...],
                            preferred_element_type=jnp.float32)

    @pl.when(k == pl.num_programs(1) - 1)
    def _():
        o_ref[...] = (acc_ref[...] + b_ref[...]).astype(o_ref.dtype)


def _choose_tiles(n_rows, in_dim, out_pad, x_itemsize, w_itemsize):
    """Pick (tm, tk) so double-buffered tiles fit the VMEM budget."""
    # K tile: whole reduction when it fits comfortably, else a 128-multiple
    # divisor of in_dim (a non-dividing tk would accumulate garbage from the
    # ragged tail, so we never do that).
    if in_dim <= 4096:
        tk = in_dim
    else:
        tk = in_dim
        for cand in (4096, 2048, 1024, 512, 256, 128):
            if in_dim % cand == 0:
                tk = cand
                break

    # VMEM per row-tile tm:  x 2*tm*tk*xB  +  out 2*tm*out_pad*4  + acc tm*out_pad*4
    # fixed:                 W^T 2*tk*out_pad*wB  +  bias 2*out_pad*4
    fixed = 2 * tk * out_pad * w_itemsize + 2 * out_pad * 4
    per_row = 2 * tk * x_itemsize + 3 * out_pad * 4
    tm = (_VMEM_BUDGET - fixed) // max(per_row, 1)
    tm = max(256, (tm // 256) * 256)          # MXU-M friendly (256x256 arrays)
    tm = min(tm, 4096)
    tm = min(tm, _round_up(n_rows, 8))        # never bigger than the problem

    # Give v7x's second TensorCore work: at least two "parallel" row tiles when
    # the batch is big enough to amortize the ~0.35 us per-step overhead.
    if tm >= n_rows and n_rows >= 512:
        tm = _round_up((n_rows + 1) // 2, 8)
    return tm, tk


def logistic_regression_multi(x, weight, bias, *, input_size):
    """Forward of LogisticRegressionMulti.

    x      : any shape whose element count is divisible by input_size
    weight : (output_size, input_size)   -- nn.Linear layout
    bias   : (output_size,)
    returns: (N, output_size), N = x.size // input_size
    """
    x2d = x.reshape(-1, input_size)
    if x2d.dtype not in (jnp.float32, jnp.bfloat16):
        x2d = x2d.astype(jnp.float32)
    n_rows, in_dim = x2d.shape
    out_dim = weight.shape[0]
    out_pad = _round_up(out_dim, 128)          # lane-dense output width

    # Host-side layout plumbing (fuses under jit; in a real model store the
    # weight pre-transposed/pre-padded so this runs once, not per forward).
    w_t = jnp.transpose(weight).astype(x2d.dtype)            # (In, Out)
    if out_pad != out_dim:
        w_t = jnp.pad(w_t, ((0, 0), (0, out_pad - out_dim)))
    b2d = jnp.pad(bias.astype(jnp.float32).reshape(1, out_dim),
                  ((0, 0), (0, out_pad - out_dim)))

    tm, tk = _choose_tiles(n_rows, in_dim, out_pad,
                           x2d.dtype.itemsize, w_t.dtype.itemsize)
    grid = (pl.cdiv(n_rows, tm), in_dim // tk)

    out_dtype = jnp.bfloat16 if x2d.dtype == jnp.bfloat16 else jnp.float32

    cost = pl.CostEstimate(
        flops=2 * n_rows * in_dim * out_dim,
        transcendentals=0,
        bytes_accessed=(x2d.size * x2d.dtype.itemsize
                        + w_t.size * w_t.dtype.itemsize
                        + n_rows * out_pad * jnp.dtype(out_dtype).itemsize),
    )

    out = pl.pallas_call(
        _linear_kernel,
        out_shape=jax.ShapeDtypeStruct((n_rows, out_pad), out_dtype),
        grid_spec=pltpu.PrefetchScalarGridSpec(
            num_scalar_prefetch=0,
            grid=grid,
            in_specs=[
                pl.BlockSpec((tm, tk), lambda i, k: (i, k)),        # x rows
                pl.BlockSpec((tk, out_pad), lambda i, k: (k, 0)),   # W^T (padded)
                pl.BlockSpec((1, out_pad), lambda i, k: (0, 0)),    # bias (padded)
            ],
            out_specs=pl.BlockSpec((tm, out_pad), lambda i, k: (i, 0)),
            scratch_shapes=[pltpu.VMEM((tm, out_pad), jnp.float32)],
        ),
        compiler_params=pltpu.CompilerParams(
            dimension_semantics=("parallel", "arbitrary"),
            vmem_limit_bytes=_VMEM_LIMIT,
        ),
        cost_estimate=cost,
    )(x2d, w_t, b2d)

    # Drop the zero-padded lanes (kernel rows past n_rows are never written).
    return out[:, :out_dim]


if __name__ == "__main__":
    INPUT_SIZE = 256          # 16 * 16  (x.reshape(-1, input_size))
    OUTPUT_SIZE = 10

    k0, k1, k2 = jax.random.split(jax.random.PRNGKey(0), 3)
    x = jax.random.normal(k0, (2, 4, 16, 16), dtype=jnp.float32)
    weight = 0.1 * jax.random.normal(k1, (OUTPUT_SIZE, INPUT_SIZE),
                                     dtype=jnp.float32)
    bias = 0.1 * jax.random.normal(k2, (OUTPUT_SIZE,), dtype=jnp.float32)

    fwd = jax.jit(functools.partial(logistic_regression_multi,
                                    input_size=INPUT_SIZE))
    out = jax.block_until_ready(fwd(x, weight, bias))

    # Pure-JAX reference check of the nn.Linear semantics.
    ref = x.reshape(-1, INPUT_SIZE) @ weight.T + bias
    assert out.shape == (8, OUTPUT_SIZE) and out.dtype == jnp.float32
    assert jnp.allclose(out, ref, atol=1e-4, rtol=1e-4)
    print("KERNEL_OK")
</pallas_src>

<mosaic_0001>
module attributes {stable_mosaic.version = 11 : i64} {
  func.func @_linear_kernel(%arg0: i32, %arg1: i32, %arg2: memref<8x256xf32, #tpu.memory_space<vmem>>, %arg3: memref<256x128xf32, #tpu.memory_space<vmem>>, %arg4: memref<1x128xf32, #tpu.memory_space<vmem>>, %arg5: memref<8x128xf32, #tpu.memory_space<vmem>>, %arg6: memref<8x128xf32, #tpu.memory_space<vmem>>) attributes {dimension_semantics = [#tpu.dimension_semantics<parallel>, #tpu.dimension_semantics<arbitrary>], iteration_bounds = array<i64: 1, 1>, scalar_prefetch = 0 : i64, scratch_operands = 1 : i64, tpu.core_type = #tpu.core_type<tc>, window_params = [{transform_indices = @transform_0, window_bounds = array<i64: 8, 256>}, {transform_indices = @transform_1, window_bounds = array<i64: 256, 128>}, {pipeline_mode = #tpu.pipeline_mode<synchronous>, transform_indices = @transform_2, window_bounds = array<i64: 1, 128>}, {transform_indices = @transform_3, window_bounds = array<i64: 8, 128>}]} {
    %c0_i32 = arith.constant 0 : i32
    %0 = arith.cmpi eq, %arg1, %c0_i32 : i32
    %1 = arith.extui %0 : i1 to i32
    %c0_i32_0 = arith.constant 0 : i32
    %2 = arith.cmpi ne, %1, %c0_i32_0 : i32
    scf.if %2 {
      %cst_10 = arith.constant 0.000000e+00 : f32
      %12 = vector.broadcast %cst_10 : f32 to vector<8x128xf32>
      %c0_11 = arith.constant 0 : index
      %c0_12 = arith.constant 0 : index
      %13 = vector.load %arg6[%c0_11, %c0_12] : memref<8x128xf32, #tpu.memory_space<vmem>>, vector<8x128xf32>
      tpu.vector_store %arg6[%c0_11, %c0_12], %12 {strides = array<i32>} : memref<8x128xf32, #tpu.memory_space<vmem>>, vector<8x128xf32>,
    } else {
    }
    %c0 = arith.constant 0 : index
    %c0_1 = arith.constant 0 : index
    %3 = vector.load %arg6[%c0, %c0_1] : memref<8x128xf32, #tpu.memory_space<vmem>>, vector<8x128xf32>
    %c0_2 = arith.constant 0 : index
    %c0_3 = arith.constant 0 : index
    %4 = vector.load %arg2[%c0_2, %c0_3] : memref<8x256xf32, #tpu.memory_space<vmem>>, vector<8x256xf32>
    %c0_4 = arith.constant 0 : index
    %c0_5 = arith.constant 0 : index
    %5 = vector.load %arg3[%c0_4, %c0_5] : memref<256x128xf32, #tpu.memory_space<vmem>>, vector<256x128xf32>
    %cst = arith.constant dense<0.000000e+00> : vector<8x128xf32>
    %6 = tpu.matmul %4, %5, %cst {dimension_numbers = #tpu.dot_dimension_numbers<[1], [0], [0], [1], [0, 0, 1, 1], [], []>} : vector<8x256xf32>, vector<256x128xf32>, vector<8x128xf32> -> vector<8x128xf32>
    %7 = arith.addf %3, %6 : vector<8x128xf32>
    %c0_6 = arith.constant 0 : index
    %c0_7 = arith.constant 0 : index
    %8 = vector.load %arg6[%c0_6, %c0_7] : memref<8x128xf32, #tpu.memory_space<vmem>>, vector<8x128xf32>
    tpu.vector_store %arg6[%c0_6, %c0_7], %7 {strides = array<i32>} : memref<8x128xf32, #tpu.memory_space<vmem>>, vector<8x128xf32>,
    %c0_i32_8 = arith.constant 0 : i32
    %9 = arith.cmpi eq, %arg1, %c0_i32_8 : i32
    %10 = arith.extui %9 : i1 to i32
    %c0_i32_9 = arith.constant 0 : i32
    %11 = arith.cmpi ne, %10, %c0_i32_9 : i32
    scf.if %11 {
      %c0_10 = arith.constant 0 : index
      %c0_11 = arith.constant 0 : index
      %12 = vector.load %arg6[%c0_10, %c0_11] : memref<8x128xf32, #tpu.memory_space<vmem>>, vector<8x128xf32>
      %c0_12 = arith.constant 0 : index
      %c0_13 = arith.constant 0 : index
      %13 = vector.load %arg4[%c0_12, %c0_13] : memref<1x128xf32, #tpu.memory_space<vmem>>, vector<1x128xf32>
      %14 = vector.broadcast %13 : vector<1x128xf32> to vector<8x128xf32>
      %15 = arith.addf %12, %14 : vector<8x128xf32>
      %c0_14 = arith.constant 0 : index
      %c0_15 = arith.constant 0 : index
      %16 = vector.load %arg5[%c0_14, %c0_15] : memref<8x128xf32, #tpu.memory_space<vmem>>, vector<8x128xf32>
      tpu.vector_store %arg5[%c0_14, %c0_15], %15 {strides = array<i32>} : memref<8x128xf32, #tpu.memory_space<vmem>>, vector<8x128xf32>,
    } else {
    }
    return
  }
  func.func @transform_0(%arg0: i32, %arg1: i32) -> (i32, i32) {
    %c0_i32 = arith.constant 0 : i32
    return %arg0, %arg1 : i32, i32
  }
  func.func @transform_1(%arg0: i32, %arg1: i32) -> (i32, i32) {
    %c0_i32 = arith.constant 0 : i32
    %c0_i32_0 = arith.constant 0 : i32
    return %arg1, %c0_i32 : i32, i32
  }
  func.func @transform_2(%arg0: i32, %arg1: i32) -> (i32, i32) {
    %c0_i32 = arith.constant 0 : i32
    %c0_i32_0 = arith.constant 0 : i32
    %c0_i32_1 = arith.constant 0 : i32
    return %c0_i32, %c0_i32_0 : i32, i32
  }
  func.func @transform_3(%arg0: i32, %arg1: i32) -> (i32, i32) {
    %c0_i32 = arith.constant 0 : i32
    %c0_i32_0 = arith.constant 0 : i32
    return %arg0, %c0_i32 : i32, i32
  }
}

</mosaic_0001>

<bundles_post_ra>
// kernel: logistic_regression_multi.1
= control target key start
LH: loop header
LB: loop body
LE: loop exit
PB: predicated region body
PF: predicated region fallthrough
CT: control target
= control target key end

     0   :  { %s385_s0 = inlined_call_operand.vmem [shape: f32[8,256], index: 0, kind: input, shape index: {}]   ;;  %s386_s1 = inlined_call_operand.vmem [shape: f32[256,128], index: 1, kind: input, shape index: {}]   ;;  %s387_s2 = inlined_call_operand.vmem [shape: f32[1,128], index: 2, kind: input, shape index: {}]   ;;  %s388_s3 = inlined_call_operand.hbm [shape: f32[8,128], index: 3, kind: output, shape index: {}]  }
   0x1   :  { %v39_v0 = vld [vmem:[%s386_s1 + $0x80] sm:$0xff]  ;;  %v40_v1 = vld [vmem:[%s386_s1 + $0x88] sm:$0xff]  ;;  %v41_v5 = vld [vmem:[%s386_s1 + $0x90] sm:$0xff] }
   0x2   :  { %v23_v2 = vld [vmem:[%s386_s1] sm:$0xff]  ;;  %v190_v3 = vpack.c.bf16 %v40_v1, %v39_v0  ;;  %v24_v4 = vld [vmem:[%s386_s1 + $0x8] sm:$0xff]  ;;  %v42_v6 = vld [vmem:[%s386_s1 + $0x98] sm:$0xff] }
   0x3   :  { %v192_v7 = vpack.c.bf16 %v24_v4, %v23_v2  ;;  %v194_v8 = vpack.c.bf16 %v42_v6, %v41_v5  ;;  %v25_v9 = vld [vmem:[%s386_s1 + $0x10] sm:$0xff]  ;;  %v26_v10 = vld [vmem:[%s386_s1 + $0x18] sm:$0xff]  ;;  %v43_v11 = vld [vmem:[%s386_s1 + $0xa0] sm:$0xff] }
   0x4   :  { %191 = vmatprep.subr.bf16.mxu0 %v190_v3  ;;  %v44_v12 = vld [vmem:[%s386_s1 + $0xa8] sm:$0xff]  ;;  %v196_v13 = vpack.c.bf16 %v26_v10, %v25_v9  ;;  %v27_v15 = vld [vmem:[%s386_s1 + $0x20] sm:$0xff]  ;;  %v45_v17 = vld [vmem:[%s386_s1 + $0xb0] sm:$0xff] }
   0x5   :  { %193 = vmatpush3.bf16.msra.mxu0 %v192_v7  ;;  %v198_v14 = vpack.c.bf16 %v44_v12, %v43_v11  ;;  %v28_v16 = vld [vmem:[%s386_s1 + $0x28] sm:$0xff]  ;;  %v46_v18 = vld [vmem:[%s386_s1 + $0xb8] sm:$0xff]  ;;  %v29_v21 = vld [vmem:[%s386_s1 + $0x30] sm:$0xff] }
   0x6   :  { %195 = vmatprep.subr.bf16.mxu0 %v194_v8  ;;  %v200_v19 = vpack.c.bf16 %v28_v16, %v27_v15  ;;  %v202_v20 = vpack.c.bf16 %v46_v18, %v45_v17  ;;  %v30_v22 = vld [vmem:[%s386_s1 + $0x38] sm:$0xff]  ;;  %v47_v23 = vld [vmem:[%s386_s1 + $0xc0] sm:$0xff]  ;;  %v48_v24 = vld [vmem:[%s386_s1 + $0xc8] sm:$0xff] }
   0x7   :  { %v22_v25 = vld [vmem:[%s385_s0 + $0x8] sm:$0xff] }
   0x8   :  { %119 = vmatprep.mubr.f32.mxu0 %v22_v25 }
   0x9   :  { %197 = vmatpush3.bf16.msra.mxu0 %v196_v13 }
   0xa   :  { %199 = vmatprep.subr.bf16.mxu0 %v198_v14 }
   0xb   :  { %8 = vsyncpa [#allocation4], 0  ;;  %v204_v26 = vpack.c.bf16 %v30_v22, %v29_v21  ;;  %v206_v27 = vpack.c.bf16 %v48_v24, %v47_v23  ;;  %v31_v28 = vld [vmem:[%s386_s1 + $0x40] sm:$0xff]  ;;  %v32_v29 = vld [vmem:[%s386_s1 + $0x48] sm:$0xff]  ;;  %s247_s28 = smov [#allocation3]  }
   0xc   :  { %v49_v30 = vld [vmem:[%s386_s1 + $0xd0] sm:$0xff]  ;;  %v50_v31 = vld [vmem:[%s386_s1 + $0xd8] sm:$0xff]  ;;  %v208_v32 = vpack.c.bf16 %v32_v29, %v31_v28  ;;  %v51_v36 = vld [vmem:[%s386_s1 + $0xe0] sm:$0xff]  ;;  %s146_s29 = sshll.u32 %s247_s28, 4  ;;  %s147_s29 = int_to_ptr.vmem [resolvable:$true] %s146_s29 }
   0xd   :  { %201 = vmatpush3.bf16.msra.mxu0 %v200_v19  ;;  %v210_v33 = vpack.c.bf16 %v50_v31, %v49_v30  ;;  %v33_v34 = vld [vmem:[%s386_s1 + $0x50] sm:$0xff]  ;;  %v34_v35 = vld [vmem:[%s386_s1 + $0x58] sm:$0xff]  ;;  %v52_v37 = vld [vmem:[%s386_s1 + $0xe8] sm:$0xff]  ;;  %p228_p1 = scmp.lt.s32.totalorder %s147_s29, %s147_s29 }
   0xe   :  { %203 = vmatprep.subr.bf16.mxu0 %v202_v20  ;;  %v212_v38 = vpack.c.bf16 %v34_v35, %v33_v34  ;;  %v214_v39 = vpack.c.bf16 %v52_v37, %v51_v36  ;;  %v35_v40 = vld [vmem:[%s386_s1 + $0x60] sm:$0xff]  ;;  %v36_v41 = vld [vmem:[%s386_s1 + $0x68] sm:$0xff]  ;;  %v53_v42 = vld [vmem:[%s386_s1 + $0xf0] sm:$0xff] }
   0xf   :  { %v54_v43 = vld [vmem:[%s386_s1 + $0xf8] sm:$0xff]  ;;  %v216_v44 = vpack.c.bf16 %v36_v41, %v35_v40  ;;  %v37_v46 = vld [vmem:[%s386_s1 + $0x70] sm:$0xff]  ;;  %v21_v49 = vld [vmem:[%s385_s0] sm:$0xff] }
  0x10   :  { %v218_v45 = vpack.c.bf16 %v54_v43, %v53_v42  ;;  %v38_v47 = vld [vmem:[%s386_s1 + $0x78] sm:$0xff]  ;;  %v154_v52 = vld [vmem:[%s387_s2] ss:$0 sm:$0xff]  ;;  %s223_s1 = scalar_lea.vmem %s147_s29, 128 }
  0x11   :  { %205 = vmatpush3.bf16.msra.mxu0 %v204_v26  ;;  %v220_v48 = vpack.c.bf16 %v38_v47, %v37_v46  ;;  %p224_p0 = scmp.ne.s32.totalorder %s147_s29, %s223_s1  ;;  %p229_p2 = scmp.lt.s32.totalorder %s223_s1, %s223_s1 }
  0x12   :  { %207 = vmatprep.subr.bf16.mxu0 %v206_v27 }
  0x13   :  { %p230_p3 = por %p229_p2, %p228_p1 }
  0x15   :  { %209 = vmatpush3.bf16.msra.mxu0 %v208_v32  ;;  %p231_p4 = pnand %p230_p3, %p224_p0 }
  0x16   :  { %211 = vmatprep.subr.bf16.mxu0 %v210_v33 }
  0x19   :  { %213 = vmatpush3.bf16.msra.mxu0 %v212_v38 }
  0x1a   :  { %215 = vmatprep.subr.bf16.mxu0 %v214_v39 }
  0x1d   :  { %217 = vmatpush3.bf16.msra.mxu0 %v216_v44 }
  0x1e   :  { %219 = vmatprep.subr.bf16.mxu0 %v218_v45 }
  0x21   :  { %221 = vmatpush3.bf16.msra.mxu0 %v220_v48 }
  0x24   :  { %120 = vmatmul.mubr.f32.vlgmr.msra.gmra.mrb[0].mxu0 %v21_v49 }
  0xf7   :  { %v187_v50 = vpop.f32.mrb[0].mxu0 }
  0xf8   :  { %v188_v51 = vpop.f32.mrb[1].mxu0 }
  0xf9   :  { %v189_v53 = vadd.f32 %v188_v51, %v187_v50 }
  0xfb   :  { %v138_v54 = vadd.f32 %v189_v53, %v154_v52 }
  0xfd   :  { %139 = vst [vmem:[#allocation3] sm:$0xff] %v138_v54 }
  0xfe   :  { %234 = shalt.err (!%p231_p4)
}
  0xff   :  { %s235_s4 = scalar_lea.hbm %s388_s3, 128 }
 0x100   :  { %p236_p5 = scmp.ne.s32.totalorder %s388_s3, %s235_s4  ;;  %p239_p6 = scmp.lt.u32.totalorder %s235_s4, %s388_s3 }
 0x102   :  { %p241_p7 = pnand %p239_p6, %p236_p5 }
 0x104   :  { %244 = shalt.err (!%p241_p7)
}
 0x105   :  { %149 = dma.vmem_to_hbm [thread:$0]  %s147_s29, 128, %s388_s3, [#allocation4]  }
 0x106   :  { %245 = dma.done.wait [#allocation4], 128  }
 0x107   :  { %246 = vsyncadd [#allocation4], 4294967168 }
 0x108   :  { %153 = vsyncpa [#allocation4], 1 }

</bundles_post_ra>
